<compile_context>
chip_gen: v5e
topology: v5e:2x2
jax: 0.10.0
libtpu: 0.0.40
codegen_flags: <defaults>
</compile_context>

<pallas_src>
import jax
import jax.numpy as jnp
from jax.experimental import pallas as pl
from jax.experimental.pallas import tpu as pltpu


# Row indices inside the packed (16, H) scale/bias block.
_LN_W, _LN_B = 0, 1
_N1_W, _N1_B = 2, 3
_N2_W, _N2_B = 4, 5
_N3_W, _N3_B = 6, 7
_SA_V_B, _SA_OUT_B = 8, 9
_CA_Q_B, _CA_OUT_B = 10, 11
_L2_B = 12
_CA_K_B, _CA_V_B = 13, 14
_N_VEC_ROWS = 16  # padded to a multiple of 8 sublanes


def _layernorm(v, w, b, eps=1e-5):
    mu = jnp.mean(v, axis=-1, keepdims=True)
    var = jnp.mean((v - mu) ** 2, axis=-1, keepdims=True)
    return (v - mu) * jax.lax.rsqrt(var + eps) * w + b


def _ark_classifier_kernel(
    x_ref,         # (TB, S, H)  bf16 activations
    vec_ref,       # (16, H)     f32 packed LN scales / biases / row biases
    sa_v_w_ref,    # (H, H)      bf16 self-attn V in-proj (pre-transposed)
    sa_out_w_ref,  # (H, H)      bf16
    ca_q_w_ref,    # (H, H)      bf16 cross-attn Q in-proj, 1/sqrt(hd) pre-folded
    ca_k_w_ref,    # (H, H)      bf16
    ca_v_w_ref,    # (H, H)      bf16
    ca_out_w_ref,  # (H, H)      bf16
    sel_s_ref,     # (H, NHP)    bf16 lane->head selector (score reduction)
    sel_e_ref,     # (NHP, H)    bf16 head->lane selector (prob expansion)
    l1_w_ref,      # (H, 4H)     bf16
    l1_b_ref,      # (1, 4H)     f32
    l2_w_ref,      # (4H, H)     bf16
    cls_w_ref,     # (H, Cp)     bf16 zero-padded to lane-dense Cp
    cls_b_ref,     # (1, Cp)     f32
    o_ref,         # (TB, Cp)    f32
):
    f32, bf16 = jnp.float32, jnp.bfloat16
    x_bf = x_ref[...]                                # (TB, S, H) bf16 MXU operand
    x = x_bf.astype(f32)                             # f32 copy for pooling
    TB, S, H = x.shape
    vec = vec_ref[...]

    def row(i):
        return vec[i:i + 1, :]                       # (1, H) f32

    # pooled token: mean + max over steps, then self.ln (dropout == identity)
    t = jnp.mean(x, axis=1) + jnp.max(x, axis=1)     # (TB, H) f32
    t = _layernorm(t, row(_LN_W), row(_LN_B))

    # --- self-attention, tgt length 1: softmax over a single key is exactly 1,
    #     so the block reduces to out_proj(v_proj(t)). ---
    v_sa = jnp.dot(t.astype(bf16), sa_v_w_ref[...],
                   preferred_element_type=f32) + row(_SA_V_B)
    sa = jnp.dot(v_sa.astype(bf16), sa_out_w_ref[...],
                 preferred_element_type=f32) + row(_SA_OUT_B)
    t = _layernorm(t + sa, row(_N1_W), row(_N1_B))

    # --- cross-attention: query = t (TB, H), key/value = x (TB, S, H) ---
    q = jnp.dot(t.astype(bf16), ca_q_w_ref[...],
                preferred_element_type=f32) + row(_CA_Q_B)   # scale pre-folded
    x2 = x_bf.reshape(TB * S, H)
    k = (jnp.dot(x2, ca_k_w_ref[...], preferred_element_type=f32)
         + row(_CA_K_B)).reshape(TB, S, H)
    v = (jnp.dot(x2, ca_v_w_ref[...], preferred_element_type=f32)
         + row(_CA_V_B)).reshape(TB, S, H)

    # Per-head scores via a lane->head selector matmul: (TB*S, NHP) with NHP =
    # num_heads padded to 128 lanes, so exp/sum run on NHP lanes instead of H.
    NHP = sel_s_ref.shape[1]
    qk = (q[:, None, :] * k).reshape(TB * S, H).astype(bf16)
    s = jnp.dot(qk, sel_s_ref[...],
                preferred_element_type=f32).reshape(TB, S, NHP)
    s = s - jnp.max(s, axis=1, keepdims=True)
    p = jnp.exp(s)
    denom = jnp.sum(p, axis=1, keepdims=True)        # (TB, 1, NHP)
    p = p * pl.reciprocal(denom, approx=True)        # EUP, free slot
    # Expand head probabilities back to H lanes and weight the values.
    p_full = jnp.dot(p.reshape(TB * S, NHP).astype(bf16), sel_e_ref[...],
                     preferred_element_type=f32).reshape(TB, S, H)
    attn = jnp.sum(p_full * v, axis=1)               # (TB, H) f32

    ca = jnp.dot(attn.astype(bf16), ca_out_w_ref[...],
                 preferred_element_type=f32) + row(_CA_OUT_B)
    t = _layernorm(t + ca, row(_N2_W), row(_N2_B))

    # --- feed-forward: linear2(relu(linear1(t))) ---
    h_mid = jnp.dot(t.astype(bf16), l1_w_ref[...],
                    preferred_element_type=f32) + l1_b_ref[...]
    h_mid = jnp.maximum(h_mid, 0.0)
    ff = jnp.dot(h_mid.astype(bf16), l2_w_ref[...],
                 preferred_element_type=f32) + row(_L2_B)
    t = _layernorm(t + ff, row(_N3_W), row(_N3_B))

    # --- classifier head (padded, lane-dense store) ---
    y = jnp.dot(t.astype(bf16), cls_w_ref[...],
                preferred_element_type=f32) + cls_b_ref[...]
    o_ref[...] = y.astype(o_ref.dtype)


# ------------------------------ host-side helpers ------------------------------

def _vmem_capacity_bytes():
    try:
        return int(pltpu.get_tpu_info().vmem_capacity_bytes)
    except Exception:
        return 64 * 1024 * 1024          # conservative: v7x per-TC capacity


def _max_tb_for_generation():
    try:
        kind = jax.devices()[0].device_kind.lower()
    except Exception:
        kind = ""
    # v4/v5e MXU is 128 wide -> TB=128 already fills the M dim; v6e/v7x are 256.
    return 128 if ("v4" in kind or "v5" in kind) else 256


def _tb_budget(S, H, c_pad, weight_bytes, vmem_cap, max_tb):
    """Examples per grid step sized from VMEM: single-buffered weights + 2x the
    bf16 x tile + ~6 live f32 (S,H) activation slabs + the f32 output tile."""
    per_example = (
        2 * S * H * 2            # bf16 x tile, double-buffered
        + 6 * S * H * 4          # live f32 slabs (x_f32, k, v, qk, p_full, ...)
        + 2 * c_pad * 4          # f32 output tile, double-buffered
        + 16 * H * 4             # (H)/(4H)-wide row activations
    )
    budget = int(0.75 * vmem_cap) - weight_bytes
    tb = budget // max(per_example, 1)
    return int(max(8, min(tb, max_tb)))


def _pick_tb(batch, tb_budget):
    """Return (tb, padded_batch). Prefers a tile that divides the batch so no
    host-side padding pass over x is needed."""
    if batch <= tb_budget:
        return batch, batch              # one step; block dims == full dims
    t = (min(tb_budget, batch) // 8) * 8
    while t >= 8:
        if batch % t == 0:
            return t, batch
        t -= 8
    tb = max(8, (tb_budget // 8) * 8)    # rare fallback: pad the batch
    return tb, pl.cdiv(batch, tb) * tb


def _const_spec(shape):
    idx = lambda b, _n=len(shape): (0,) * _n
    try:
        # Constant index map across the grid -> single buffer (no double-buffer VMEM).
        return pl.BlockSpec(shape, idx, pipeline_mode=pl.Buffered(1))
    except Exception:
        # TODO(synk): jax without BlockSpec.pipeline_mode -> default double-buffering.
        return pl.BlockSpec(shape, idx)


def prepack_params(params, num_heads):
    """One-time weight prepack (transpose, bf16 cast, scale folding, packing).
    Hoisted out of the forward so it never sits on the steady-state critical path."""
    H = params["sa_out_w"].shape[0]
    C = params["cls_w"].shape[0]
    assert H % num_heads == 0, "hidden_size must be divisible by num_heads"
    hd = H // num_heads
    scale = 1.0 / float(hd) ** 0.5
    c_pad = pl.cdiv(C, 128) * 128
    nh_pad = pl.cdiv(num_heads, 128) * 128
    f32, bf16 = jnp.float32, jnp.bfloat16

    # Pre-transposed bf16 weight matrices (every in-kernel matmul is (M,K)@(K,N)).
    sa_v_w = params["sa_in_w"][2 * H:3 * H, :].T.astype(bf16)      # (H, H)
    sa_out_w = params["sa_out_w"].T.astype(bf16)                   # (H, H)
    ca_q_w = (params["ca_in_w"][:H, :].T * scale).astype(bf16)     # (H, H), scale folded
    ca_k_w = params["ca_in_w"][H:2 * H, :].T.astype(bf16)          # (H, H)
    ca_v_w = params["ca_in_w"][2 * H:3 * H, :].T.astype(bf16)      # (H, H)
    ca_out_w = params["ca_out_w"].T.astype(bf16)                   # (H, H)
    l1_w = params["l1_w"].T.astype(bf16)                           # (H, 4H)
    l1_b = params["l1_b"].astype(f32)                              # (1, 4H)
    l2_w = params["l2_w"].T.astype(bf16)                           # (4H, H)
    cls_w = jnp.zeros((H, c_pad), bf16).at[:, :C].set(params["cls_w"].T.astype(bf16))
    cls_b = jnp.zeros((1, c_pad), f32).at[:, :C].set(params["cls_b"].astype(f32))

    # Precomputed head selectors (exact 0/1 in bf16; scale lives in the Q proj).
    head_of_lane = jnp.arange(H) // hd
    sel_score = (head_of_lane[:, None] == jnp.arange(nh_pad)[None, :]).astype(bf16)
    sel_expand = (jnp.arange(nh_pad)[:, None] == head_of_lane[None, :]).astype(bf16)

    # Pack all (1, H) scale/bias vectors into one f32 block -> one DMA instead of 15.
    rows = jnp.stack([
        params["ln_w"][0], params["ln_b"][0],
        params["n1_w"][0], params["n1_b"][0],
        params["n2_w"][0], params["n2_b"][0],
        params["n3_w"][0], params["n3_b"][0],
        params["sa_in_b"][0, 2 * H:3 * H], params["sa_out_b"][0],
        params["ca_in_b"][0, :H] * scale, params["ca_out_b"][0],
        params["l2_b"][0],
        params["ca_in_b"][0, H:2 * H], params["ca_in_b"][0, 2 * H:3 * H],
    ]).astype(f32)
    vec = jnp.zeros((_N_VEC_ROWS, H), f32).at[:rows.shape[0]].set(rows)

    weights = (vec, sa_v_w, sa_out_w, ca_q_w, ca_k_w, ca_v_w, ca_out_w,
               sel_score, sel_expand, l1_w, l1_b, l2_w, cls_w, cls_b)
    return {"weights": weights, "hidden": H, "num_classes": C, "c_pad": c_pad}


def ark_classifier_forward(x, packed):
    B, S, H = x.shape
    assert H == packed["hidden"]
    C, c_pad = packed["num_classes"], packed["c_pad"]
    weights = packed["weights"]

    x_bf = x.astype(jnp.bfloat16)        # halve the x HBM traffic; MXU operand dtype

    vmem_cap = _vmem_capacity_bytes()
    max_tb = _max_tb_for_generation()
    weight_bytes = int(sum(int(w.size) * w.dtype.itemsize for w in weights))
    tb, b_pad = _pick_tb(B, _tb_budget(S, H, c_pad, weight_bytes, vmem_cap, max_tb))
    if b_pad != B:
        # Rare fallback (no multiple-of-8 tile divides B); padded rows are zeros
        # and their (finite) outputs are sliced off below.
        x_bf = jnp.pad(x_bf, ((0, b_pad - B), (0, 0), (0, 0)))

    in_specs = [pl.BlockSpec((tb, S, H), lambda b: (b, 0, 0))]
    for w in weights:
        in_specs.append(_const_spec(w.shape))

    out = pl.pallas_call(
        _ark_classifier_kernel,
        out_shape=jax.ShapeDtypeStruct((b_pad, c_pad), jnp.float32),
        grid_spec=pltpu.PrefetchScalarGridSpec(
            num_scalar_prefetch=0,
            grid=(b_pad // tb,),
            in_specs=in_specs,
            out_specs=pl.BlockSpec((tb, c_pad), lambda b: (b, 0)),
        ),
        compiler_params=pltpu.CompilerParams(
            dimension_semantics=("parallel",),
            vmem_limit_bytes=int(0.9 * vmem_cap),
        ),
    )(x_bf, *weights)
    return out[:B, :C]


# ------------------------------ reference & test ------------------------------

def ref_forward(x, p, num_heads):
    """Pure-JAX f32 reference implementing the PyTorch semantics."""
    B, S, H = x.shape
    hd = H // num_heads

    def ln(v, w, b, eps=1e-5):
        mu = jnp.mean(v, -1, keepdims=True)
        var = jnp.mean((v - mu) ** 2, -1, keepdims=True)
        return (v - mu) / jnp.sqrt(var + eps) * w[0] + b[0]

    t = ln(jnp.mean(x, 1, keepdims=True) + jnp.max(x, 1, keepdims=True),
           p["ln_w"], p["ln_b"])                                      # (B,1,H)
    # self-attn on a single token -> out_proj(v_proj(t))
    v = t @ p["sa_in_w"][2 * H:3 * H].T + p["sa_in_b"][0, 2 * H:3 * H]
    t = ln(t + (v @ p["sa_out_w"].T + p["sa_out_b"][0]), p["n1_w"], p["n1_b"])
    # cross-attn
    q = t @ p["ca_in_w"][:H].T + p["ca_in_b"][0, :H]
    k = x @ p["ca_in_w"][H:2 * H].T + p["ca_in_b"][0, H:2 * H]
    vv = x @ p["ca_in_w"][2 * H:].T + p["ca_in_b"][0, 2 * H:]
    qh = q.reshape(B, 1, num_heads, hd).transpose(0, 2, 1, 3)
    kh = k.reshape(B, S, num_heads, hd).transpose(0, 2, 1, 3)
    vh = vv.reshape(B, S, num_heads, hd).transpose(0, 2, 1, 3)
    s = jnp.einsum("bhqd,bhkd->bhqk", qh, kh) / jnp.sqrt(float(hd))
    a = jax.nn.softmax(s, -1)
    o = jnp.einsum("bhqk,bhkd->bhqd", a, vh).transpose(0, 2, 1, 3).reshape(B, 1, H)
    t = ln(t + (o @ p["ca_out_w"].T + p["ca_out_b"][0]), p["n2_w"], p["n2_b"])
    ff = jax.nn.relu(t @ p["l1_w"].T + p["l1_b"][0]) @ p["l2_w"].T + p["l2_b"][0]
    t = ln(t + ff, p["n3_w"], p["n3_b"])
    return t[:, 0] @ p["cls_w"].T + p["cls_b"][0]


def make_params(key, hidden_size, num_classes):
    H, C = hidden_size, num_classes
    ks = jax.random.split(key, 12)

    def w(k, shape, scale=0.1):
        return (scale * jax.random.normal(k, shape)).astype(jnp.float32)

    return {
        # self.ln
        "ln_w": jnp.ones((1, H), jnp.float32), "ln_b": jnp.zeros((1, H), jnp.float32),
        # fusion.self_attn
        "sa_in_w": w(ks[0], (3 * H, H)), "sa_in_b": w(ks[1], (1, 3 * H)),
        "sa_out_w": w(ks[2], (H, H)), "sa_out_b": w(ks[3], (1, H)),
        "n1_w": jnp.ones((1, H), jnp.float32), "n1_b": jnp.zeros((1, H), jnp.float32),
        # fusion.multihead_attn (cross)
        "ca_in_w": w(ks[4], (3 * H, H)), "ca_in_b": w(ks[5], (1, 3 * H)),
        "ca_out_w": w(ks[6], (H, H)), "ca_out_b": w(ks[7], (1, H)),
        "n2_w": jnp.ones((1, H), jnp.float32), "n2_b": jnp.zeros((1, H), jnp.float32),
        # fusion feed-forward (dim_feedforward = 4H)
        "l1_w": w(ks[8], (4 * H, H)), "l1_b": w(ks[9], (1, 4 * H)),
        "l2_w": w(ks[10], (H, 4 * H)), "l2_b": jnp.zeros((1, H), jnp.float32),
        "n3_w": jnp.ones((1, H), jnp.float32), "n3_b": jnp.zeros((1, H), jnp.float32),
        # self.cls
        "cls_w": w(ks[11], (C, H)), "cls_b": jnp.zeros((1, C), jnp.float32),
    }


if __name__ == "__main__":
    B, S, H = 2, 8, 32          # batch, steps, hidden_size
    NUM_HEADS, NUM_CLASSES = 4, 5

    key = jax.random.PRNGKey(0)
    kx, kp = jax.random.split(key)
    x = jax.random.normal(kx, (B, S, H), dtype=jnp.float32)
    params = make_params(kp, H, NUM_CLASSES)

    packed = prepack_params(params, NUM_HEADS)      # one-time weight prepack
    y = jax.block_until_ready(ark_classifier_forward(x, packed))
    y_ref = ref_forward(x, params, NUM_HEADS)

    assert y.shape == (B, NUM_CLASSES)
    # bf16 MXU operands + approximate reciprocal -> relaxed tolerance vs f32 reference
    assert jnp.allclose(y, y_ref, rtol=5e-2, atol=5e-2), (y, y_ref)

    print("KERNEL_OK")
</pallas_src>

<mosaic_0001>
module attributes {stable_mosaic.version = 11 : i64} {
  func.func @_ark_classifier_kernel(%arg0: i32, %arg1: memref<2x8x32xbf16, #tpu.memory_space<vmem>>, %arg2: memref<16x32xf32, #tpu.memory_space<vmem>>, %arg3: memref<32x32xbf16, #tpu.memory_space<vmem>>, %arg4: memref<32x32xbf16, #tpu.memory_space<vmem>>, %arg5: memref<32x32xbf16, #tpu.memory_space<vmem>>, %arg6: memref<32x32xbf16, #tpu.memory_space<vmem>>, %arg7: memref<32x32xbf16, #tpu.memory_space<vmem>>, %arg8: memref<32x32xbf16, #tpu.memory_space<vmem>>, %arg9: memref<32x128xbf16, #tpu.memory_space<vmem>>, %arg10: memref<128x32xbf16, #tpu.memory_space<vmem>>, %arg11: memref<32x128xbf16, #tpu.memory_space<vmem>>, %arg12: memref<1x128xf32, #tpu.memory_space<vmem>>, %arg13: memref<128x32xbf16, #tpu.memory_space<vmem>>, %arg14: memref<32x128xbf16, #tpu.memory_space<vmem>>, %arg15: memref<1x128xf32, #tpu.memory_space<vmem>>, %arg16: memref<2x128xf32, #tpu.memory_space<vmem>>) attributes {dimension_semantics = [#tpu.dimension_semantics<parallel>], iteration_bounds = array<i64: 1>, scalar_prefetch = 0 : i64, scratch_operands = 0 : i64, tpu.core_type = #tpu.core_type<tc>, window_params = [{transform_indices = @transform_0, window_bounds = array<i64: 2, 8, 32>}, {pipeline_mode = #tpu.pipeline_mode<synchronous>, transform_indices = @transform_1, window_bounds = array<i64: 16, 32>}, {pipeline_mode = #tpu.pipeline_mode<synchronous>, transform_indices = @transform_2, window_bounds = array<i64: 32, 32>}, {pipeline_mode = #tpu.pipeline_mode<synchronous>, transform_indices = @transform_3, window_bounds = array<i64: 32, 32>}, {pipeline_mode = #tpu.pipeline_mode<synchronous>, transform_indices = @transform_4, window_bounds = array<i64: 32, 32>}, {pipeline_mode = #tpu.pipeline_mode<synchronous>, transform_indices = @transform_5, window_bounds = array<i64: 32, 32>}, {pipeline_mode = #tpu.pipeline_mode<synchronous>, transform_indices = @transform_6, window_bounds = array<i64: 32, 32>}, {pipeline_mode = #tpu.pipeline_mode<synchronous>, transform_indices = @transform_7, window_bounds = array<i64: 32, 32>}, {pipeline_mode = #tpu.pipeline_mode<synchronous>, transform_indices = @transform_8, window_bounds = array<i64: 32, 128>}, {pipeline_mode = #tpu.pipeline_mode<synchronous>, transform_indices = @transform_9, window_bounds = array<i64: 128, 32>}, {pipeline_mode = #tpu.pipeline_mode<synchronous>, transform_indices = @transform_10, window_bounds = array<i64: 32, 128>}, {pipeline_mode = #tpu.pipeline_mode<synchronous>, transform_indices = @transform_11, window_bounds = array<i64: 1, 128>}, {pipeline_mode = #tpu.pipeline_mode<synchronous>, transform_indices = @transform_12, window_bounds = array<i64: 128, 32>}, {pipeline_mode = #tpu.pipeline_mode<synchronous>, transform_indices = @transform_13, window_bounds = array<i64: 32, 128>}, {pipeline_mode = #tpu.pipeline_mode<synchronous>, transform_indices = @transform_14, window_bounds = array<i64: 1, 128>}, {transform_indices = @transform_15, window_bounds = array<i64: 2, 128>}]} {
    %c0 = arith.constant 0 : index
    %c0_0 = arith.constant 0 : index
    %c0_1 = arith.constant 0 : index
    %0 = vector.load %arg1[%c0, %c0_0, %c0_1] : memref<2x8x32xbf16, #tpu.memory_space<vmem>>, vector<2x8x32xbf16>
    %1 = arith.extf %0 : vector<2x8x32xbf16> to vector<2x8x32xf32>
    %c0_2 = arith.constant 0 : index
    %c0_3 = arith.constant 0 : index
    %2 = vector.load %arg2[%c0_2, %c0_3] : memref<16x32xf32, #tpu.memory_space<vmem>>, vector<16x32xf32>
    %cst = arith.constant dense<0.000000e+00> : vector<2x32xf32>
    %3 = vector.multi_reduction <add>, %1, %cst [1] : vector<2x8x32xf32> to vector<2x32xf32>
    %cst_4 = arith.constant 8.000000e+00 : f32
    %4 = vector.broadcast %cst_4 : f32 to vector<2x32xf32>
    %5 = arith.divf %3, %4 : vector<2x32xf32>
    %cst_5 = arith.constant dense<0xFF800000> : vector<2x32xf32>
    %6 = vector.multi_reduction <maximumf>, %1, %cst_5 [1] : vector<2x8x32xf32> to vector<2x32xf32>
    %7 = arith.addf %5, %6 : vector<2x32xf32>
    %8 = vector.extract_strided_slice %2 {offsets = [0, 0], sizes = [1, 32], strides = [1, 1]} : vector<16x32xf32> to vector<1x32xf32>
    %9 = vector.extract_strided_slice %2 {offsets = [1, 0], sizes = [1, 32], strides = [1, 1]} : vector<16x32xf32> to vector<1x32xf32>
    %cst_6 = arith.constant dense<0.000000e+00> : vector<2xf32>
    %10 = vector.multi_reduction <add>, %7, %cst_6 [1] : vector<2x32xf32> to vector<2xf32>
    %11 = vector.shape_cast %10 : vector<2xf32> to vector<2x1xf32>
    %cst_7 = arith.constant 3.200000e+01 : f32
    %12 = vector.broadcast %cst_7 : f32 to vector<2x1xf32>
    %13 = arith.divf %11, %12 : vector<2x1xf32>
    %14 = vector.broadcast %13 : vector<2x1xf32> to vector<2x32xf32>
    %15 = arith.subf %7, %14 : vector<2x32xf32>
    %16 = arith.mulf %15, %15 : vector<2x32xf32>
    %cst_8 = arith.constant dense<0.000000e+00> : vector<2xf32>
    %17 = vector.multi_reduction <add>, %16, %cst_8 [1] : vector<2x32xf32> to vector<2xf32>
    %18 = vector.shape_cast %17 : vector<2xf32> to vector<2x1xf32>
    %cst_9 = arith.constant 3.200000e+01 : f32
    %19 = vector.broadcast %cst_9 : f32 to vector<2x1xf32>
    %20 = arith.divf %18, %19 : vector<2x1xf32>
    %21 = vector.broadcast %13 : vector<2x1xf32> to vector<2x32xf32>
    %22 = arith.subf %7, %21 : vector<2x32xf32>
    %cst_10 = arith.constant 9.99999974E-6 : f32
    %23 = vector.broadcast %cst_10 : f32 to vector<2x1xf32>
    %24 = arith.addf %20, %23 : vector<2x1xf32>
    %25 = math.rsqrt %24 : vector<2x1xf32>
    %26 = vector.broadcast %25 : vector<2x1xf32> to vector<2x32xf32>
    %27 = arith.mulf %22, %26 : vector<2x32xf32>
    %28 = vector.broadcast %8 : vector<1x32xf32> to vector<2x32xf32>
    %29 = arith.mulf %27, %28 : vector<2x32xf32>
    %30 = vector.broadcast %9 : vector<1x32xf32> to vector<2x32xf32>
    %31 = arith.addf %29, %30 : vector<2x32xf32>
    %32 = arith.truncf %31 : vector<2x32xf32> to vector<2x32xbf16>
    %c0_11 = arith.constant 0 : index
    %c0_12 = arith.constant 0 : index
    %33 = vector.load %arg3[%c0_11, %c0_12] : memref<32x32xbf16, #tpu.memory_space<vmem>>, vector<32x32xbf16>
    %cst_13 = arith.constant dense<0.000000e+00> : vector<2x32xf32>
    %34 = tpu.matmul %32, %33, %cst_13 {dimension_numbers = #tpu.dot_dimension_numbers<[1], [0], [0], [1], [0, 0, 1, 1], [], []>} : vector<2x32xbf16>, vector<32x32xbf16>, vector<2x32xf32> -> vector<2x32xf32>
    %35 = vector.extract_strided_slice %2 {offsets = [8, 0], sizes = [1, 32], strides = [1, 1]} : vector<16x32xf32> to vector<1x32xf32>
    %36 = vector.broadcast %35 : vector<1x32xf32> to vector<2x32xf32>
    %37 = arith.addf %34, %36 : vector<2x32xf32>
    %38 = arith.truncf %37 : vector<2x32xf32> to vector<2x32xbf16>
    %c0_14 = arith.constant 0 : index
    %c0_15 = arith.constant 0 : index
    %39 = vector.load %arg4[%c0_14, %c0_15] : memref<32x32xbf16, #tpu.memory_space<vmem>>, vector<32x32xbf16>
    %cst_16 = arith.constant dense<0.000000e+00> : vector<2x32xf32>
    %40 = tpu.matmul %38, %39, %cst_16 {dimension_numbers = #tpu.dot_dimension_numbers<[1], [0], [0], [1], [0, 0, 1, 1], [], []>} : vector<2x32xbf16>, vector<32x32xbf16>, vector<2x32xf32> -> vector<2x32xf32>
    %41 = vector.extract_strided_slice %2 {offsets = [9, 0], sizes = [1, 32], strides = [1, 1]} : vector<16x32xf32> to vector<1x32xf32>
    %42 = vector.broadcast %41 : vector<1x32xf32> to vector<2x32xf32>
    %43 = arith.addf %40, %42 : vector<2x32xf32>
    %44 = arith.addf %31, %43 : vector<2x32xf32>
    %45 = vector.extract_strided_slice %2 {offsets = [2, 0], sizes = [1, 32], strides = [1, 1]} : vector<16x32xf32> to vector<1x32xf32>
    %46 = vector.extract_strided_slice %2 {offsets = [3, 0], sizes = [1, 32], strides = [1, 1]} : vector<16x32xf32> to vector<1x32xf32>
    %cst_17 = arith.constant dense<0.000000e+00> : vector<2xf32>
    %47 = vector.multi_reduction <add>, %44, %cst_17 [1] : vector<2x32xf32> to vector<2xf32>
    %48 = vector.shape_cast %47 : vector<2xf32> to vector<2x1xf32>
    %cst_18 = arith.constant 3.200000e+01 : f32
    %49 = vector.broadcast %cst_18 : f32 to vector<2x1xf32>
    %50 = arith.divf %48, %49 : vector<2x1xf32>
    %51 = vector.broadcast %50 : vector<2x1xf32> to vector<2x32xf32>
    %52 = arith.subf %44, %51 : vector<2x32xf32>
    %53 = arith.mulf %52, %52 : vector<2x32xf32>
    %cst_19 = arith.constant dense<0.000000e+00> : vector<2xf32>
    %54 = vector.multi_reduction <add>, %53, %cst_19 [1] : vector<2x32xf32> to vector<2xf32>
    %55 = vector.shape_cast %54 : vector<2xf32> to vector<2x1xf32>
    %cst_20 = arith.constant 3.200000e+01 : f32
    %56 = vector.broadcast %cst_20 : f32 to vector<2x1xf32>
    %57 = arith.divf %55, %56 : vector<2x1xf32>
    %58 = vector.broadcast %50 : vector<2x1xf32> to vector<2x32xf32>
    %59 = arith.subf %44, %58 : vector<2x32xf32>
    %cst_21 = arith.constant 9.99999974E-6 : f32
    %60 = vector.broadcast %cst_21 : f32 to vector<2x1xf32>
    %61 = arith.addf %57, %60 : vector<2x1xf32>
    %62 = math.rsqrt %61 : vector<2x1xf32>
    %63 = vector.broadcast %62 : vector<2x1xf32> to vector<2x32xf32>
    %64 = arith.mulf %59, %63 : vector<2x32xf32>
    %65 = vector.broadcast %45 : vector<1x32xf32> to vector<2x32xf32>
    %66 = arith.mulf %64, %65 : vector<2x32xf32>
    %67 = vector.broadcast %46 : vector<1x32xf32> to vector<2x32xf32>
    %68 = arith.addf %66, %67 : vector<2x32xf32>
    %69 = arith.truncf %68 : vector<2x32xf32> to vector<2x32xbf16>
    %c0_22 = arith.constant 0 : index
    %c0_23 = arith.constant 0 : index
    %70 = vector.load %arg5[%c0_22, %c0_23] : memref<32x32xbf16, #tpu.memory_space<vmem>>, vector<32x32xbf16>
    %cst_24 = arith.constant dense<0.000000e+00> : vector<2x32xf32>
    %71 = tpu.matmul %69, %70, %cst_24 {dimension_numbers = #tpu.dot_dimension_numbers<[1], [0], [0], [1], [0, 0, 1, 1], [], []>} : vector<2x32xbf16>, vector<32x32xbf16>, vector<2x32xf32> -> vector<2x32xf32>
    %72 = vector.extract_strided_slice %2 {offsets = [10, 0], sizes = [1, 32], strides = [1, 1]} : vector<16x32xf32> to vector<1x32xf32>
    %73 = vector.broadcast %72 : vector<1x32xf32> to vector<2x32xf32>
    %74 = arith.addf %71, %73 : vector<2x32xf32>
    %75 = vector.shape_cast %0 : vector<2x8x32xbf16> to vector<16x32xbf16>
    %c0_25 = arith.constant 0 : index
    %c0_26 = arith.constant 0 : index
    %76 = vector.load %arg6[%c0_25, %c0_26] : memref<32x32xbf16, #tpu.memory_space<vmem>>, vector<32x32xbf16>
    %cst_27 = arith.constant dense<0.000000e+00> : vector<16x32xf32>
    %77 = tpu.matmul %75, %76, %cst_27 {dimension_numbers = #tpu.dot_dimension_numbers<[1], [0], [0], [1], [0, 0, 1, 1], [], []>} : vector<16x32xbf16>, vector<32x32xbf16>, vector<16x32xf32> -> vector<16x32xf32>
    %78 = vector.extract_strided_slice %2 {offsets = [13, 0], sizes = [1, 32], strides = [1, 1]} : vector<16x32xf32> to vector<1x32xf32>
    %79 = vector.broadcast %78 : vector<1x32xf32> to vector<16x32xf32>
    %80 = arith.addf %77, %79 : vector<16x32xf32>
    %81 = vector.shape_cast %80 : vector<16x32xf32> to vector<2x8x32xf32>
    %c0_28 = arith.constant 0 : index
    %c0_29 = arith.constant 0 : index
    %82 = vector.load %arg7[%c0_28, %c0_29] : memref<32x32xbf16, #tpu.memory_space<vmem>>, vector<32x32xbf16>
    %cst_30 = arith.constant dense<0.000000e+00> : vector<16x32xf32>
    %83 = tpu.matmul %75, %82, %cst_30 {dimension_numbers = #tpu.dot_dimension_numbers<[1], [0], [0], [1], [0, 0, 1, 1], [], []>} : vector<16x32xbf16>, vector<32x32xbf16>, vector<16x32xf32> -> vector<16x32xf32>
    %84 = vector.extract_strided_slice %2 {offsets = [14, 0], sizes = [1, 32], strides = [1, 1]} : vector<16x32xf32> to vector<1x32xf32>
    %85 = vector.broadcast %84 : vector<1x32xf32> to vector<16x32xf32>
    %86 = arith.addf %83, %85 : vector<16x32xf32>
    %87 = vector.shape_cast %86 : vector<16x32xf32> to vector<2x8x32xf32>
    %88 = vector.shape_cast %74 : vector<2x32xf32> to vector<2x1x32xf32>
    %89 = vector.broadcast %88 : vector<2x1x32xf32> to vector<2x8x32xf32>
    %90 = arith.mulf %89, %81 : vector<2x8x32xf32>
    %91 = vector.shape_cast %90 : vector<2x8x32xf32> to vector<16x32xf32>
    %92 = arith.truncf %91 : vector<16x32xf32> to vector<16x32xbf16>
    %c0_31 = arith.constant 0 : index
    %c0_32 = arith.constant 0 : index
    %93 = vector.load %arg9[%c0_31, %c0_32] : memref<32x128xbf16, #tpu.memory_space<vmem>>, vector<32x128xbf16>
    %cst_33 = arith.constant dense<0.000000e+00> : vector<16x128xf32>
    %94 = tpu.matmul %92, %93, %cst_33 {dimension_numbers = #tpu.dot_dimension_numbers<[1], [0], [0], [1], [0, 0, 1, 1], [], []>} : vector<16x32xbf16>, vector<32x128xbf16>, vector<16x128xf32> -> vector<16x128xf32>
    %95 = vector.shape_cast %94 : vector<16x128xf32> to vector<2x8x128xf32>
    %cst_34 = arith.constant dense<0xFF800000> : vector<2x128xf32>
    %96 = vector.multi_reduction <maximumf>, %95, %cst_34 [1] : vector<2x8x128xf32> to vector<2x128xf32>
    %97 = vector.shape_cast %96 : vector<2x128xf32> to vector<2x1x128xf32>
    %98 = vector.broadcast %97 : vector<2x1x128xf32> to vector<2x8x128xf32>
    %99 = arith.subf %95, %98 : vector<2x8x128xf32>
    %100 = math.exp %99 : vector<2x8x128xf32>
    %cst_35 = arith.constant dense<0.000000e+00> : vector<2x128xf32>
    %101 = vector.multi_reduction <add>, %100, %cst_35 [1] : vector<2x8x128xf32> to vector<2x128xf32>
    %102 = vector.shape_cast %101 : vector<2x128xf32> to vector<2x1x128xf32>
    %103 = tpu.reciprocal %102 {approx = true} : vector<2x1x128xf32> -> vector<2x1x128xf32>
    %104 = vector.broadcast %103 : vector<2x1x128xf32> to vector<2x8x128xf32>
    %105 = arith.mulf %100, %104 : vector<2x8x128xf32>
    %106 = vector.shape_cast %105 : vector<2x8x128xf32> to vector<16x128xf32>
    %107 = arith.truncf %106 : vector<16x128xf32> to vector<16x128xbf16>
    %c0_36 = arith.constant 0 : index
    %c0_37 = arith.constant 0 : index
    %108 = vector.load %arg10[%c0_36, %c0_37] : memref<128x32xbf16, #tpu.memory_space<vmem>>, vector<128x32xbf16>
    %cst_38 = arith.constant dense<0.000000e+00> : vector<16x32xf32>
    %109 = tpu.matmul %107, %108, %cst_38 {dimension_numbers = #tpu.dot_dimension_numbers<[1], [0], [0], [1], [0, 0, 1, 1], [], []>} : vector<16x128xbf16>, vector<128x32xbf16>, vector<16x32xf32> -> vector<16x32xf32>
    %110 = vector.shape_cast %109 : vector<16x32xf32> to vector<2x8x32xf32>
    %111 = arith.mulf %110, %87 : vector<2x8x32xf32>
    %cst_39 = arith.constant dense<0.000000e+00> : vector<2x32xf32>
    %112 = vector.multi_reduction <add>, %111, %cst_39 [1] : vector<2x8x32xf32> to vector<2x32xf32>
    %113 = arith.truncf %112 : vector<2x32xf32> to vector<2x32xbf16>
    %c0_40 = arith.constant 0 : index
    %c0_41 = arith.constant 0 : index
    %114 = vector.load %arg8[%c0_40, %c0_41] : memref<32x32xbf16, #tpu.memory_space<vmem>>, vector<32x32xbf16>
    %cst_42 = arith.constant dense<0.000000e+00> : vector<2x32xf32>
    %115 = tpu.matmul %113, %114, %cst_42 {dimension_numbers = #tpu.dot_dimension_numbers<[1], [0], [0], [1], [0, 0, 1, 1], [], []>} : vector<2x32xbf16>, vector<32x32xbf16>, vector<2x32xf32> -> vector<2x32xf32>
    %116 = vector.extract_strided_slice %2 {offsets = [11, 0], sizes = [1, 32], strides = [1, 1]} : vector<16x32xf32> to vector<1x32xf32>
    %117 = vector.broadcast %116 : vector<1x32xf32> to vector<2x32xf32>
    %118 = arith.addf %115, %117 : vector<2x32xf32>
    %119 = arith.addf %68, %118 : vector<2x32xf32>
    %120 = vector.extract_strided_slice %2 {offsets = [4, 0], sizes = [1, 32], strides = [1, 1]} : vector<16x32xf32> to vector<1x32xf32>
    %121 = vector.extract_strided_slice %2 {offsets = [5, 0], sizes = [1, 32], strides = [1, 1]} : vector<16x32xf32> to vector<1x32xf32>
    %cst_43 = arith.constant dense<0.000000e+00> : vector<2xf32>
    %122 = vector.multi_reduction <add>, %119, %cst_43 [1] : vector<2x32xf32> to vector<2xf32>
    %123 = vector.shape_cast %122 : vector<2xf32> to vector<2x1xf32>
    %cst_44 = arith.constant 3.200000e+01 : f32
    %124 = vector.broadcast %cst_44 : f32 to vector<2x1xf32>
    %125 = arith.divf %123, %124 : vector<2x1xf32>
    %126 = vector.broadcast %125 : vector<2x1xf32> to vector<2x32xf32>
    %127 = arith.subf %119, %126 : vector<2x32xf32>
    %128 = arith.mulf %127, %127 : vector<2x32xf32>
    %cst_45 = arith.constant dense<0.000000e+00> : vector<2xf32>
    %129 = vector.multi_reduction <add>, %128, %cst_45 [1] : vector<2x32xf32> to vector<2xf32>
    %130 = vector.shape_cast %129 : vector<2xf32> to vector<2x1xf32>
    %cst_46 = arith.constant 3.200000e+01 : f32
    %131 = vector.broadcast %cst_46 : f32 to vector<2x1xf32>
    %132 = arith.divf %130, %131 : vector<2x1xf32>
    %133 = vector.broadcast %125 : vector<2x1xf32> to vector<2x32xf32>
    %134 = arith.subf %119, %133 : vector<2x32xf32>
    %cst_47 = arith.constant 9.99999974E-6 : f32
    %135 = vector.broadcast %cst_47 : f32 to vector<2x1xf32>
    %136 = arith.addf %132, %135 : vector<2x1xf32>
    %137 = math.rsqrt %136 : vector<2x1xf32>
    %138 = vector.broadcast %137 : vector<2x1xf32> to vector<2x32xf32>
    %139 = arith.mulf %134, %138 : vector<2x32xf32>
    %140 = vector.broadcast %120 : vector<1x32xf32> to vector<2x32xf32>
    %141 = arith.mulf %139, %140 : vector<2x32xf32>
    %142 = vector.broadcast %121 : vector<1x32xf32> to vector<2x32xf32>
    %143 = arith.addf %141, %142 : vector<2x32xf32>
    %144 = arith.truncf %143 : vector<2x32xf32> to vector<2x32xbf16>
    %c0_48 = arith.constant 0 : index
    %c0_49 = arith.constant 0 : index
    %145 = vector.load %arg11[%c0_48, %c0_49] : memref<32x128xbf16, #tpu.memory_space<vmem>>, vector<32x128xbf16>
    %cst_50 = arith.constant dense<0.000000e+00> : vector<2x128xf32>
    %146 = tpu.matmul %144, %145, %cst_50 {dimension_numbers = #tpu.dot_dimension_numbers<[1], [0], [0], [1], [0, 0, 1, 1], [], []>} : vector<2x32xbf16>, vector<32x128xbf16>, vector<2x128xf32> -> vector<2x128xf32>
    %c0_51 = arith.constant 0 : index
    %c0_52 = arith.constant 0 : index
    %147 = vector.load %arg12[%c0_51, %c0_52] : memref<1x128xf32, #tpu.memory_space<vmem>>, vector<1x128xf32>
    %148 = vector.broadcast %147 : vector<1x128xf32> to vector<2x128xf32>
    %149 = arith.addf %146, %148 : vector<2x128xf32>
    %cst_53 = arith.constant 0.000000e+00 : f32
    %150 = vector.broadcast %cst_53 : f32 to vector<2x128xf32>
    %151 = arith.maximumf %149, %150 : vector<2x128xf32>
    %152 = arith.truncf %151 : vector<2x128xf32> to vector<2x128xbf16>
    %c0_54 = arith.constant 0 : index
    %c0_55 = arith.constant 0 : index
    %153 = vector.load %arg13[%c0_54, %c0_55] : memref<128x32xbf16, #tpu.memory_space<vmem>>, vector<128x32xbf16>
    %cst_56 = arith.constant dense<0.000000e+00> : vector<2x32xf32>
    %154 = tpu.matmul %152, %153, %cst_56 {dimension_numbers = #tpu.dot_dimension_numbers<[1], [0], [0], [1], [0, 0, 1, 1], [], []>} : vector<2x128xbf16>, vector<128x32xbf16>, vector<2x32xf32> -> vector<2x32xf32>
    %155 = vector.extract_strided_slice %2 {offsets = [12, 0], sizes = [1, 32], strides = [1, 1]} : vector<16x32xf32> to vector<1x32xf32>
    %156 = vector.broadcast %155 : vector<1x32xf32> to vector<2x32xf32>
    %157 = arith.addf %154, %156 : vector<2x32xf32>
    %158 = arith.addf %143, %157 : vector<2x32xf32>
    %159 = vector.extract_strided_slice %2 {offsets = [6, 0], sizes = [1, 32], strides = [1, 1]} : vector<16x32xf32> to vector<1x32xf32>
    %160 = vector.extract_strided_slice %2 {offsets = [7, 0], sizes = [1, 32], strides = [1, 1]} : vector<16x32xf32> to vector<1x32xf32>
    %cst_57 = arith.constant dense<0.000000e+00> : vector<2xf32>
    %161 = vector.multi_reduction <add>, %158, %cst_57 [1] : vector<2x32xf32> to vector<2xf32>
    %162 = vector.shape_cast %161 : vector<2xf32> to vector<2x1xf32>
    %cst_58 = arith.constant 3.200000e+01 : f32
    %163 = vector.broadcast %cst_58 : f32 to vector<2x1xf32>
    %164 = arith.divf %162, %163 : vector<2x1xf32>
    %165 = vector.broadcast %164 : vector<2x1xf32> to vector<2x32xf32>
    %166 = arith.subf %158, %165 : vector<2x32xf32>
    %167 = arith.mulf %166, %166 : vector<2x32xf32>
    %cst_59 = arith.constant dense<0.000000e+00> : vector<2xf32>
    %168 = vector.multi_reduction <add>, %167, %cst_59 [1] : vector<2x32xf32> to vector<2xf32>
    %169 = vector.shape_cast %168 : vector<2xf32> to vector<2x1xf32>
    %cst_60 = arith.constant 3.200000e+01 : f32
    %170 = vector.broadcast %cst_60 : f32 to vector<2x1xf32>
    %171 = arith.divf %169, %170 : vector<2x1xf32>
    %172 = vector.broadcast %164 : vector<2x1xf32> to vector<2x32xf32>
    %173 = arith.subf %158, %172 : vector<2x32xf32>
    %cst_61 = arith.constant 9.99999974E-6 : f32
    %174 = vector.broadcast %cst_61 : f32 to vector<2x1xf32>
    %175 = arith.addf %171, %174 : vector<2x1xf32>
    %176 = math.rsqrt %175 : vector<2x1xf32>
    %177 = vector.broadcast %176 : vector<2x1xf32> to vector<2x32xf32>
    %178 = arith.mulf %173, %177 : vector<2x32xf32>
    %179 = vector.broadcast %159 : vector<1x32xf32> to vector<2x32xf32>
    %180 = arith.mulf %178, %179 : vector<2x32xf32>
    %181 = vector.broadcast %160 : vector<1x32xf32> to vector<2x32xf32>
    %182 = arith.addf %180, %181 : vector<2x32xf32>
    %183 = arith.truncf %182 : vector<2x32xf32> to vector<2x32xbf16>
    %c0_62 = arith.constant 0 : index
    %c0_63 = arith.constant 0 : index
    %184 = vector.load %arg14[%c0_62, %c0_63] : memref<32x128xbf16, #tpu.memory_space<vmem>>, vector<32x128xbf16>
    %cst_64 = arith.constant dense<0.000000e+00> : vector<2x128xf32>
    %185 = tpu.matmul %183, %184, %cst_64 {dimension_numbers = #tpu.dot_dimension_numbers<[1], [0], [0], [1], [0, 0, 1, 1], [], []>} : vector<2x32xbf16>, vector<32x128xbf16>, vector<2x128xf32> -> vector<2x128xf32>
    %c0_65 = arith.constant 0 : index
    %c0_66 = arith.constant 0 : index
    %186 = vector.load %arg15[%c0_65, %c0_66] : memref<1x128xf32, #tpu.memory_space<vmem>>, vector<1x128xf32>
    %187 = vector.broadcast %186 : vector<1x128xf32> to vector<2x128xf32>
    %188 = arith.addf %185, %187 : vector<2x128xf32>
    %c0_67 = arith.constant 0 : index
    %c0_68 = arith.constant 0 : index
    %189 = vector.load %arg16[%c0_67, %c0_68] : memref<2x128xf32, #tpu.memory_space<vmem>>, vector<2x128xf32>
    tpu.vector_store %arg16[%c0_67, %c0_68], %188 {strides = array<i32>} : memref<2x128xf32, #tpu.memory_space<vmem>>, vector<2x128xf32>,
    return
  }
  func.func @transform_0(%arg0: i32) -> (i32, i32, i32) {
    %c0_i32 = arith.constant 0 : i32
    %c0_i32_0 = arith.constant 0 : i32
    %c0_i32_1 = arith.constant 0 : i32
    return %arg0, %c0_i32, %c0_i32_0 : i32, i32, i32
  }
  func.func @transform_1(%arg0: i32) -> (i32, i32) {
    %c0_i32 = arith.constant 0 : i32
    %c0_i32_0 = arith.constant 0 : i32
    %c0_i32_1 = arith.constant 0 : i32
    return %c0_i32, %c0_i32_0 : i32, i32
  }
  func.func @transform_2(%arg0: i32) -> (i32, i32) {
    %c0_i32 = arith.constant 0 : i32
    %c0_i32_0 = arith.constant 0 : i32
    %c0_i32_1 = arith.constant 0 : i32
    return %c0_i32, %c0_i32_0 : i32, i32
  }
  func.func @transform_3(%arg0: i32) -> (i32, i32) {
    %c0_i32 = arith.constant 0 : i32
    %c0_i32_0 = arith.constant 0 : i32
    %c0_i32_1 = arith.constant 0 : i32
    return %c0_i32, %c0_i32_0 : i32, i32
  }
  func.func @transform_4(%arg0: i32) -> (i32, i32) {
    %c0_i32 = arith.constant 0 : i32
    %c0_i32_0 = arith.constant 0 : i32
    %c0_i32_1 = arith.constant 0 : i32
    return %c0_i32, %c0_i32_0 : i32, i32
  }
  func.func @transform_5(%arg0: i32) -> (i32, i32) {
    %c0_i32 = arith.constant 0 : i32
    %c0_i32_0 = arith.constant 0 : i32
    %c0_i32_1 = arith.constant 0 : i32
    return %c0_i32, %c0_i32_0 : i32, i32
  }
  func.func @transform_6(%arg0: i32) -> (i32, i32) {
    %c0_i32 = arith.constant 0 : i32
    %c0_i32_0 = arith.constant 0 : i32
    %c0_i32_1 = arith.constant 0 : i32
    return %c0_i32, %c0_i32_0 : i32, i32
  }
  func.func @transform_7(%arg0: i32) -> (i32, i32) {
    %c0_i32 = arith.constant 0 : i32
    %c0_i32_0 = arith.constant 0 : i32
    %c0_i32_1 = arith.constant 0 : i32
    return %c0_i32, %c0_i32_0 : i32, i32
  }
  func.func @transform_8(%arg0: i32) -> (i32, i32) {
    %c0_i32 = arith.constant 0 : i32
    %c0_i32_0 = arith.constant 0 : i32
    %c0_i32_1 = arith.constant 0 : i32
    return %c0_i32, %c0_i32_0 : i32, i32
  }
  func.func @transform_9(%arg0: i32) -> (i32, i32) {
    %c0_i32 = arith.constant 0 : i32
    %c0_i32_0 = arith.constant 0 : i32
    %c0_i32_1 = arith.constant 0 : i32
    return %c0_i32, %c0_i32_0 : i32, i32
  }
  func.func @transform_10(%arg0: i32) -> (i32, i32) {
    %c0_i32 = arith.constant 0 : i32
    %c0_i32_0 = arith.constant 0 : i32
    %c0_i32_1 = arith.constant 0 : i32
    return %c0_i32, %c0_i32_0 : i32, i32
  }
  func.func @transform_11(%arg0: i32) -> (i32, i32) {
    %c0_i32 = arith.constant 0 : i32
    %c0_i32_0 = arith.constant 0 : i32
    %c0_i32_1 = arith.constant 0 : i32
    return %c0_i32, %c0_i32_0 : i32, i32
  }
  func.func @transform_12(%arg0: i32) -> (i32, i32) {
    %c0_i32 = arith.constant 0 : i32
    %c0_i32_0 = arith.constant 0 : i32
    %c0_i32_1 = arith.constant 0 : i32
    return %c0_i32, %c0_i32_0 : i32, i32
  }
  func.func @transform_13(%arg0: i32) -> (i32, i32) {
    %c0_i32 = arith.constant 0 : i32
    %c0_i32_0 = arith.constant 0 : i32
    %c0_i32_1 = arith.constant 0 : i32
    return %c0_i32, %c0_i32_0 : i32, i32
  }
  func.func @transform_14(%arg0: i32) -> (i32, i32) {
    %c0_i32 = arith.constant 0 : i32
    %c0_i32_0 = arith.constant 0 : i32
    %c0_i32_1 = arith.constant 0 : i32
    return %c0_i32, %c0_i32_0 : i32, i32
  }
  func.func @transform_15(%arg0: i32) -> (i32, i32) {
    %c0_i32 = arith.constant 0 : i32
    %c0_i32_0 = arith.constant 0 : i32
    return %arg0, %c0_i32 : i32, i32
  }
}

</mosaic_0001>

<bundles_post_ra>
// kernel: tpu_custom_call.1
= control target key start
LH: loop header
LB: loop body
LE: loop exit
PB: predicated region body
PF: predicated region fallthrough
CT: control target
= control target key end

     0   :  { %20 = vsyncpa [#allocation3], 0  ;;  %s1515_s0 = inlined_call_operand.hbm [shape: bf16[2,8,32], index: 0, kind: input, shape index: {}]   ;;  %s1516_s1 = inlined_call_operand.vmem [shape: f32[16,32], index: 1, kind: input, shape index: {}]   ;;  %s1517_s2 = inlined_call_operand.vmem [shape: bf16[32,32], index: 2, kind: input, shape index: {}]   ;;  %s1518_s3 = inlined_call_operand.vmem [shape: bf16[32,32], index: 3, kind: input, shape index: {}]   ;;  %s1519_s4 = inlined_call_operand.vmem [shape: bf16[32,32], index: 4, kind: input, shape index: {}]   ;;  %s1520_s5 = inlined_call_operand.vmem [shape: bf16[32,32], index: 5, kind: input, shape index: {}]   ;;  %s1521_s6 = inlined_call_operand.vmem [shape: bf16[32,32], index: 6, kind: input, shape index: {}]   ;;  %s1522_s7 = inlined_call_operand.vmem [shape: bf16[32,32], index: 7, kind: input, shape index: {}]   ;;  %s1523_s8 = inlined_call_operand.vmem [shape: bf16[32,128], index: 8, kind: input, shape index: {}]   ;;  %s1524_s9 = inlined_call_operand.vmem [shape: bf16[128,32], index: 9, kind: input, shape index: {}]   ;;  %s1525_s10 = inlined_call_operand.vmem [shape: bf16[32,128], index: 10, kind: input, shape index: {}]   ;;  %s1526_s11 = inlined_call_operand.vmem [shape: f32[1,128], index: 11, kind: input, shape index: {}]   ;;  %s1527_s12 = inlined_call_operand.vmem [shape: bf16[128,32], index: 12, kind: input, shape index: {}]   ;;  %s1528_s13 = inlined_call_operand.hbm [shape: bf16[32,128], index: 13, kind: input, shape index: {}]   ;;  %s1529_s14 = inlined_call_operand.vmem [shape: f32[1,128], index: 14, kind: input, shape index: {}]   ;;  %s1530_s15 = inlined_call_operand.hbm [shape: f32[2,128], index: 15, kind: output, shape index: {}]  }
   0x1   :  { %21 = vsyncpa [#allocation6], 0 }
   0x2   :  { %22 = vsyncpa [#allocation4], 0  ;;  %s27_s20 = sshll.u32 %s1515_s0, 4  ;;  %s1232_s21 = smov [#allocation2]   ;;  %s28_s20 = int_to_ptr.hbm [resolvable:$true] %s27_s20 }
   0x3   :  { %s29_s22 = sshll.u32 %s1232_s21, 4  ;;  %s64_s25 = sshll.u32 %s1528_s13, 4  ;;  %s30_s22 = int_to_ptr.vmem [resolvable:$true] %s29_s22  ;;  %s65_s25 = int_to_ptr.hbm [resolvable:$true] %s64_s25 }
   0x4   :  { %s1233_s26 = smov 64   ;;  %s1234_s27 = smov 4  }
   0x5   :  { %35 = dma.hbm_to_vmem [thread:$0]  %s28_s20, 128, %s30_s22, [#allocation3], %s1233_s26, %s1233_s26, %s1234_s27  }
   0x6   :  { %s1235_s28 = smov [#allocation5]  }
   0x7   :  { %s66_s29 = sshll.u32 %s1235_s28, 4  ;;  %s67_s29 = int_to_ptr.vmem [resolvable:$true] %s66_s29 }
   0x8   :  { %72 = dma.hbm_to_vmem [thread:$0]  %s65_s25, 256, %s67_s29, [#allocation6], %s1233_s26, %s1233_s26, %s1234_s27  }
   0x9   :  { %1226 = dma.done.wait [#allocation3], 128  }
   0xa   :  { %1227 = vsyncadd [#allocation3], 4294967168 }
   0xb   :  { %1228 = dma.done.wait [#allocation6], 256  }
   0xc   :  { %1229 = vsyncadd [#allocation6], 4294967040  ;;  %v1236_v0 = vmov 8.0   ;;  %v84_v2 = vld [vmem:[#allocation2] sm:$0xff]   ;;  %vm90_vm0 = vcmask 261120   ;;  %vm132_vm2 = vcmask 1041409  }
   0xd   :  { %1134 = vrcp.f32 %v1236_v0  ;;  %v86_v3 = vunpack.c.l.bf16 %v84_v2  ;;  %v87_v4 = vunpack.c.h.bf16 %v84_v2  ;;  %vm135_vm3 = vcmask 254976   ;;  %v1092_v61 = vld [vmem:[%s1517_s2 + $0x8] sm:$0xff]  ;;  %v1091_v62 = vld [vmem:[%s1517_s2] sm:$0xff]  ;;  %s1238_s29 = smov [#allocation7]   ;;  %s930_s0 = sshll.u32 %s1530_s15, 4  ;;  %s931_s0 = int_to_ptr.hbm [resolvable:$true] %s930_s0 }
   0xe   :  { %v1237_v44 = vmov 32.0   ;;  %222 = vmatpush.bf16.msra.mxu0 %v1092_v61  ;;  %v1094_v2 = vld [vmem:[%s1518_s3 + $0x8] sm:$0xff] }
   0xf   :  { %v91_v6 = vsel %vm90_vm0, %v86_v3, 0.0  ;;  %v98_v7 = vsel %vm90_vm0, %v87_v4, 0.0  ;;  %v114_v9 = vsel %vm90_vm0, %v86_v3, -inf  ;;  %v121_v13 = vsel %vm90_vm0, %v87_v4, -inf  ;;  %256 = vmatpush.bf16.msra.mxu1 %v1094_v2 }
  0x10   :  { %v92_v10 = vrot.slane %v91_v6, 4  ;;  %v99_v11 = vrot.slane %v98_v7, 4  ;;  %v115_v12 = vrot.slane %v114_v9, 4  ;;  %v122_v15 = vrot.slane %v121_v13, 4 }
  0x11   :  { %1136 = vrcp.f32 %v1237_v44 }
  0x12   :  { %v93_v16 = vadd.f32 %v92_v10, %v91_v6  ;;  %v100_v17 = vadd.f32 %v99_v11, %v98_v7  ;;  %v116_v18 = vmax.f32 %v114_v9, %v115_v12  ;;  %v123_v19 = vmax.f32 %v121_v13, %v122_v15  ;;  %223 = vmatpush.bf16.msra.mxu0 %v1091_v62  ;;  %v1349_v7 = vld [vmem:[%s1516_s1] sm:$0xff] }
  0x13   :  { %v1135_v1 = vpop.eup %1134  ;;  %v181_v10 = vperm.slane %v1349_v7, 0 }
  0x14   :  { %v106_v5 = vmul.f32 8.0, %v1135_v1  ;;  %v94_v20 = vrot.slane %v93_v16, 2  ;;  %v101_v21 = vrot.slane %v100_v17, 2  ;;  %v117_v22 = vrot.slane %v116_v18, 2 }
  0x15   :  { %v124_v24 = vrot.slane %v123_v19, 2  ;;  %vm110_vm1 = vweird.f32 %v1135_v1 }
  0x16   :  { %v107_v8 = vsub.f32 1.0, %v106_v5  ;;  %v95_v25 = vadd.f32 %v94_v20, %v93_v16  ;;  %v102_v26 = vadd.f32 %v101_v21, %v100_v17  ;;  %v118_v27 = vmax.f32 %v116_v18, %v117_v22 }
  0x17   :  { %v125_v28 = vmax.f32 %v123_v19, %v124_v24  ;;  %v1137_v45 = vpop.eup %1136 }
  0x18   :  { %v108_v14 = vmul.f32 %v1135_v1, %v107_v8  ;;  %v96_v29 = vrot.slane %v95_v25, 1  ;;  %v103_v30 = vrot.slane %v102_v26, 1  ;;  %v119_v31 = vrot.slane %v118_v27, 1 }
  0x19   :  { %v126_v33 = vrot.slane %v125_v28, 1  ;;  %v140_v46 = vmul.f32 32.0, %v1137_v45  ;;  %vm144_vm4 = vweird.f32 %v1137_v45 }
  0x1a   :  { %v109_v23 = vadd.f32 %v1135_v1, %v108_v14  ;;  %v97_v34 = vadd.f32 %v96_v29, %v95_v25  ;;  %v104_v35 = vadd.f32 %v103_v30, %v102_v26  ;;  %v120_v36 = vmax.f32 %v118_v27, %v119_v31  ;;  %v1093_v27 = vld [vmem:[%s1518_s3] sm:$0xff] }
  0x1b   :  { %v127_v37 = vmax.f32 %v125_v28, %v126_v33  ;;  %v141_v47 = vsub.f32 1.0, %v140_v46  ;;  %v184_v14 = vperm.slane %v1349_v7, 1  ;;  %257 = vmatpush.bf16.msra.mxu1 %v1093_v27  ;;  %v1361_v28 = vld [vmem:[%s1516_s1 + $0x8] sm:$0xff] }
  0x1c   :  { %v111_v32 = vsel %vm110_vm1, %v1135_v1, %v109_v23  ;;  %v193_v29 = vperm.slane %v1361_v28, 0 }
  0x1d   :  { %v112_v38 = vmul.f32 %v111_v32, %v97_v34  ;;  %v113_v39 = vmul.f32 %v111_v32, %v104_v35  ;;  %v142_v48 = vmul.f32 %v1137_v45, %v141_v47  ;;  %v234_v34 = vperm.slane %v1361_v28, 1 }
  0x1f   :  { %v128_v40 = vadd.f32 %v120_v36, %v112_v38  ;;  %v129_v41 = vadd.f32 %v127_v37, %v113_v39  ;;  %v143_v49 = vadd.f32 %v1137_v45, %v142_v48 }
  0x21   :  { %v133_v42 = vsel %vm132_vm2, %v129_v41, %v128_v40  ;;  %v1331_v50 = vsel %vm144_vm4, %v1137_v45, %v143_v49 }
  0x22   :  { %v136_v43 = vsel %vm135_vm3, %v133_v42, 0.0 }
  0x23   :  { %137 = vadd.xlane.f32.xlu0 %v136_v43 }
  0x96   :  { %v138_v51 = vpop.xlane.xlu0 %137 }
  0x97   :  { %v146_v52 = vmul.f32 %v1331_v50, %v138_v51 }
  0x99   :  { %v148_v53 = vrot.slane %v146_v52, 1  ;;  %v151_v54 = vsub.f32 %v128_v40, %v146_v52 }
  0x9b   :  { %v152_v55 = vsub.f32 %v129_v41, %v148_v53  ;;  %v153_v57 = vmul.f32 %v151_v54, %v151_v54 }
  0x9d   :  { %v154_v56 = vmul.f32 %v152_v55, %v152_v55 }
  0x9f   :  { %v157_v58 = vrot.slane %v154_v56, 7  ;;  %v1097_v56 = vld [vmem:[%s1520_s5] sm:$0xff] }
  0xa1   :  { %v158_v59 = vsel %vm132_vm2, %v157_v58, %v153_v57  ;;  %v1377_v57 = vld [vmem:[#allocation2] sm:$0xff]  ;;  %v1096_v58 = vld [vmem:[%s1519_s4 + $0x8] sm:$0xff] }
  0xa2   :  { %v160_v60 = vsel %vm135_vm3, %v158_v59, 0.0  ;;  %353 = vmatpush.bf16.msra.mxu2 %v1096_v58  ;;  %v1095_v59 = vld [vmem:[%s1519_s4] sm:$0xff] }
  0xa3   :  { %161 = vadd.xlane.f32.xlu0 %v160_v60 }
  0xa6   :  { %354 = vmatpush.bf16.msra.mxu2 %v1095_v59 }
 0x116   :  { %v162_v63 = vpop.xlane.xlu0 %161 }
 0x117   :  { %v163_v0 = vmul.f32 %v162_v63, %v1331_v50 }
 0x119   :  { %v164_v1 = vadd.f32 1e-05, %v163_v0 }
 0x11b   :  { %1138 = vrsqrt.f32 %v164_v1  ;;  %vm171_vm6 = vweird.f32 %v164_v1 }
 0x121   :  { %v1139_v3 = vpop.eup %1138 }
 0x122   :  { %v166_v4 = vmul.f32 %v1139_v3, %v164_v1  ;;  %vm172_vm5 = vweird.f32 %v1139_v3 }
 0x123   :  { %vm173_vm7 = vmor %vm171_vm6, %vm172_vm5 }
 0x124   :  { %v167_v5 = vmul.f32 %v1139_v3, %v166_v4 }
 0x126   :  { %v168_v6 = vmul.f32 0.5, %v167_v5  ;;  %v312_v5 = vperm.slane %v1349_v7, 2 }
 0x128   :  { %v169_v8 = vsub.f32 1.5, %v168_v6 }
 0x12a   :  { %v170_v9 = vmul.f32 %v1139_v3, %v169_v8 }
 0x12c   :  { %v174_v11 = vsel %vm173_vm7, %v1139_v3, %v170_v9 }
 0x12d   :  { %v176_v12 = vrot.slane %v174_v11, 1  ;;  %v179_v13 = vmul.f32 %v174_v11, %v151_v54 }
 0x12f   :  { %v180_v15 = vmul.f32 %v176_v12, %v152_v55  ;;  %v182_v16 = vmul.f32 %v181_v10, %v179_v13  ;;  %v1098_v55 = vld [vmem:[%s1520_s5 + $0x8] sm:$0xff] }
 0x130   :  { %391 = vmatpush.bf16.msra.mxu3 %v1098_v55  ;;  %v1105_v55 = vld [vmem:[%s1524_s9 + $0x10] sm:$0xff] }
 0x131   :  { %v183_v17 = vmul.f32 %v181_v10, %v180_v15  ;;  %v185_v18 = vadd.f32 %v184_v14, %v182_v16  ;;  %v315_v10 = vperm.slane %v1349_v7, 3 }
 0x133   :  { %v186_v19 = vadd.f32 %v184_v14, %v183_v17  ;;  %v187_v20 = vpack.c.bf16 %v185_v18, %v185_v18 }
 0x134   :  { %392 = vmatpush.bf16.msra.mxu3 %v1097_v56 }
 0x135   :  { %v188_v21 = vpack.c.bf16 %v186_v19, %v186_v19  ;;  %v196_v23 = vunpack.c.l.b16 %v187_v20 }
 0x137   :  { %v197_v22 = vunpack.c.l.b16 %v188_v21  ;;  %980 = vmatmul.msk.bf16.vlgmr.msra.gmra.mxu3 %vm90_vm0, %v1377_v57 }
 0x139   :  { %v198_v24 = vrot.slane %v197_v22, 7 }
 0x13b   :  { %v199_v25 = vsel %vm132_vm2, %v198_v24, %v196_v23  ;;  %v1102_v23 = vld [vmem:[%s1523_s8 + $0x8] sm:$0xff]  ;;  %v1101_v24 = vld [vmem:[%s1523_s8] sm:$0xff] }
 0x13c   :  { %v200_v26 = vpack.c.b16 %v199_v25, %v199_v25  ;;  %464 = vmatpush.bf16.msrb.mxu1 %v1102_v23 }
 0x13e   :  { %949 = vmatmul.msk.bf16.vlgmr.msra.gmra.mxu0 %vm90_vm0, %v200_v26  ;;  %v324_v26 = vperm.slane %v1361_v28, 2 }
 0x140   :  { %465 = vmatpush.bf16.msrb.mxu1 %v1101_v24 }
 0x1ba   :  { %v394_v25 = vpop.f32.mrf.mxu3 }
 0x1bb   :  { %v225_v30 = vpop.f32.mrf.mxu0 }
 0x1bc   :  { %v226_v31 = vadd.f32 %v225_v30, %v193_v29  ;;  %v364_v29 = vperm.slane %v1361_v28, 5 }
 0x1be   :  { %v229_v32 = vpack.c.bf16 %v226_v31, %v226_v31 }
 0x1c0   :  { %958 = vmatmul.msk.bf16.vlgmr.msra.gmra.mxu1 %vm90_vm0, %v229_v32 }
 0x1c2   :  { %v396_v31 = vpop.f32.mrf.mxu3 }
 0x1c3   :  { %v227_v33 = vpop.f32.mrf.mxu0 }
 0x23d   :  { %v259_v35 = vpop.f32.mrf.mxu1 }
 0x23e   :  { %v260_v36 = vadd.f32 %v259_v35, %v234_v34  ;;  %v395_v34 = vadd.f32 %v394_v25, %v364_v29  ;;  %v397_v35 = vadd.f32 %v396_v31, %v364_v29  ;;  %v1112_v29 = vld [vmem:[%s1522_s7 + $0x8] sm:$0xff] }
 0x23f   :  { %635 = vmatpush.bf16.msrb.mxu3 %v1112_v29  ;;  %v1120_v29 = vld [vmem:[%s1527_s12 + $0x28] sm:$0xff] }
 0x240   :  { %v264_v37 = vrot.slane %v260_v36, 1  ;;  %v267_v39 = vadd.f32 %v260_v36, %v185_v18 }
 0x242   :  { %v268_v38 = vadd.f32 %v264_v37, %v186_v19 }
 0x244   :  { %v271_v40 = vrot.slane %v268_v38, 7 }
 0x245   :  { %v261_v41 = vpop.f32.mrf.mxu1 }
 0x246   :  { %v272_v42 = vsel %vm132_vm2, %v271_v40, %v267_v39  ;;  %v1110_v41 = vld [vmem:[%s1524_s9 + $0x38] sm:$0xff] }
 0x247   :  { %v274_v43 = vsel %vm135_vm3, %v272_v42, 0.0  ;;  %571 = vmatpush.bf16.msrb.mxu2 %v1110_v41  ;;  %v1109_v42 = vld [vmem:[%s1524_s9 + $0x30] sm:$0xff] }
 0x248   :  { %275 = vadd.xlane.f32.xlu1 %v274_v43  ;;  %v1100_v43 = vld [vmem:[%s1521_s6 + $0x8] sm:$0xff] }
 0x249   :  { %422 = vmatpush.bf16.msrb.mxu0 %v1100_v43 }
 0x24b   :  { %572 = vmatpush.bf16.msrb.mxu2 %v1109_v42 }
 0x2bb   :  { %v276_v44 = vpop.xlane.xlu1 %275 }
 0x2bc   :  { %v277_v45 = vmul.f32 %v276_v44, %v1331_v50  ;;  %v1108_v44 = vld [vmem:[%s1524_s9 + $0x28] sm:$0xff] }
 0x2bd   :  { %573 = vmatpush.bf16.msrb.mxu2 %v1108_v44 }
 0x2be   :  { %v279_v46 = vrot.slane %v277_v45, 1  ;;  %v282_v47 = vsub.f32 %v267_v39, %v277_v45  ;;  %v1099_v45 = vld [vmem:[%s1521_s6] sm:$0xff] }
 0x2bf   :  { %423 = vmatpush.bf16.msrb.mxu0 %v1099_v45 }
 0x2c0   :  { %v283_v48 = vsub.f32 %v268_v38, %v279_v46  ;;  %v284_v51 = vmul.f32 %v282_v47, %v282_v47 }
 0x2c2   :  { %v285_v49 = vmul.f32 %v283_v48, %v283_v48  ;;  %989 = vmatmul.msk.bf16.vlgmr.msrb.gmra.mxu0 %vm90_vm0, %v1377_v57  ;;  %v1104_v57 = vld [vmem:[%s1524_s9 + $0x8] sm:$0xff] }
 0x2c4   :  { %v288_v52 = vrot.slane %v285_v49, 7 }
 0x2c6   :  { %v289_v53 = vsel %vm132_vm2, %v288_v52, %v284_v51  ;;  %v1106_v51 = vld [vmem:[%s1524_s9 + $0x18] sm:$0xff] }
 0x2c7   :  { %v291_v54 = vsel %vm135_vm3, %v289_v53, 0.0 }
 0x2c8   :  { %292 = vadd.xlane.f32.xlu1 %v291_v54 }
 0x33b   :  { %v293_v60 = vpop.xlane.xlu1 %292 }
 0x33c   :  { %v294_v61 = vmul.f32 %v293_v60, %v1331_v50 }
 0x33e   :  { %v295_v62 = vadd.f32 1e-05, %v294_v61 }
 0x33f   :  { %v425_v31 = vpop.f32.mrf.mxu0 }
 0x340   :  { %1140 = vrsqrt.f32 %v295_v62  ;;  %vm302_vm9 = vweird.f32 %v295_v62 }
 0x346   :  { %v1141_v63 = vpop.eup %1140 }
 0x347   :  { %v297_v0 = vmul.f32 %v1141_v63, %v295_v62  ;;  %vm303_vm8 = vweird.f32 %v1141_v63 }
 0x348   :  { %vm304_vm10 = vmor %vm302_vm9, %vm303_vm8 }
 0x349   :  { %v298_v1 = vmul.f32 %v1141_v63, %v297_v0 }
 0x34b   :  { %v299_v2 = vmul.f32 0.5, %v298_v1  ;;  %v1103_v1 = vld [vmem:[%s1524_s9] sm:$0xff] }
 0x34d   :  { %v300_v3 = vsub.f32 1.5, %v299_v2 }
 0x34f   :  { %v301_v4 = vmul.f32 %v1141_v63, %v300_v3 }
 0x351   :  { %v305_v6 = vsel %vm304_vm10, %v1141_v63, %v301_v4 }
 0x352   :  { %v307_v8 = vrot.slane %v305_v6, 1  ;;  %v310_v9 = vmul.f32 %v305_v6, %v282_v47  ;;  %v1107_v47 = vld [vmem:[%s1524_s9 + $0x20] sm:$0xff]  ;;  %s928_s9 = sshll.u32 %s1238_s29, 4  ;;  %s929_s9 = int_to_ptr.vmem [resolvable:$true] %s928_s9 }
 0x353   :  { %574 = vmatpush.bf16.msrb.mxu2 %v1107_v47 }
 0x354   :  { %v311_v11 = vmul.f32 %v307_v8, %v283_v48  ;;  %v313_v12 = vmul.f32 %v312_v5, %v310_v9 }
 0x356   :  { %v314_v13 = vmul.f32 %v312_v5, %v311_v11  ;;  %v1390_v14 = vadd.f32 %v315_v10, %v313_v12 }
 0x357   :  { %575 = vmatpush.bf16.msrb.mxu2 %v1106_v51 }
 0x358   :  { %v1392_v15 = vadd.f32 %v315_v10, %v314_v13  ;;  %v318_v16 = vpack.c.bf16 %v1390_v14, %v1390_v14 }
 0x35a   :  { %v319_v17 = vpack.c.bf16 %v1392_v15, %v1392_v15  ;;  %v327_v19 = vunpack.c.l.b16 %v318_v16 }
 0x35b   :  { %576 = vmatpush.bf16.msrb.mxu2 %v1105_v55 }
 0x35c   :  { %v328_v18 = vunpack.c.l.b16 %v319_v17 }
 0x35e   :  { %v329_v20 = vrot.slane %v328_v18, 7 }
 0x35f   :  { %577 = vmatpush.bf16.msrb.mxu2 %v1104_v57 }
 0x360   :  { %v330_v21 = vsel %vm132_vm2, %v329_v20, %v327_v19 }
 0x361   :  { %v331_v22 = vpack.c.b16 %v330_v21, %v330_v21 }
 0x363   :  { %967 = vmatmul.msk.bf16.vlgmr.msra.gmra.mxu2 %vm90_vm0, %v331_v22 }
 0x364   :  { %578 = vmatpush.bf16.msrb.mxu2 %v1103_v1 }
 0x3e6   :  { %v356_v27 = vpop.f32.mrf.mxu2 }
 0x3e7   :  { %v357_v30 = vadd.f32 %v356_v27, %v324_v26 }
 0x3e9   :  { %v431_v32 = vrot.slane %v357_v30, 1  ;;  %v432_v33 = vperm.slane %v357_v30, 0  ;;  %v403_v30 = vperm.slane %v1361_v28, 6 }
 0x3eb   :  { %v433_v36 = vperm.slane %v431_v32, 0  ;;  %v436_v37 = vmul.f32 %v432_v33, %v395_v34  ;;  %v1111_v32 = vld [vmem:[%s1522_s7] sm:$0xff]  ;;  %v426_v33 = vadd.f32 %v425_v31, %v403_v30 }
 0x3ec   :  { %636 = vmatpush.bf16.msrb.mxu3 %v1111_v32  ;;  %v1119_v32 = vld [vmem:[%s1527_s12 + $0x20] sm:$0xff] }
 0x3ed   :  { %v437_v38 = vmul.f32 %v433_v36, %v397_v35 }
 0x3ee   :  { %v358_v39 = vpop.f32.mrf.mxu2 }
 0x3ef   :  { %v438_v40 = vpack.c.bf16 %v437_v38, %v436_v37  ;;  %v427_v37 = vpop.f32.mrf.mxu0 }
 0x3f1   :  { %998 = vmatmul.msk.bf16.vlgmr.msrb.gmra.mxu1 %vm90_vm0, %v438_v40  ;;  %v428_v40 = vadd.f32 %v427_v37, %v403_v30  ;;  %v694_v37 = vperm.slane %v1349_v7, 5 }
 0x46e   :  { %v467_v46 = vpop.f32.mrf.mxu1 }
 0x46f   :  { %v472_v48 = vrot.slane %v467_v46, 4 }
 0x471   :  { %v473_v49 = vmax.f32 %v467_v46, %v472_v48 }
 0x473   :  { %v474_v52 = vrot.slane %v473_v49, 2 }
 0x475   :  { %v475_v53 = vmax.f32 %v473_v49, %v474_v52 }
 0x476   :  { %v469_v54 = vpop.f32.mrf.mxu1 }
 0x477   :  { %v476_v56 = vrot.slane %v475_v53, 1  ;;  %v478_v58 = vrot.slane %v469_v54, 4 }
 0x479   :  { %v477_v59 = vmax.f32 %v475_v53, %v476_v56  ;;  %v479_v60 = vmax.f32 %v469_v54, %v478_v58 }
 0x47b   :  { %v484_v61 = vsub.f32 %v467_v46, %v477_v59  ;;  %v480_v62 = vrot.slane %v479_v60, 2 }
 0x47d   :  { %v486_v63 = vmul.f32 1.442695, %v484_v61  ;;  %v481_v0 = vmax.f32 %v479_v60, %v480_v62  ;;  %v607_v61 = vperm.slane %v1361_v28, 3 }
 0x47f   :  { %1142 = vpow2.f32 %v486_v63  ;;  %v482_v2 = vrot.slane %v481_v0, 1 }
 0x481   :  { %v483_v3 = vmax.f32 %v481_v0, %v482_v2 }
 0x483   :  { %v485_v4 = vsub.f32 %v469_v54, %v483_v3 }
 0x485   :  { %v1143_v5 = vpop.eup %1142  ;;  %v488_v6 = vmul.f32 1.442695, %v485_v4 }
 0x486   :  { %v490_v8 = vrot.slane %v1143_v5, 4 }
 0x487   :  { %1144 = vpow2.f32 %v488_v6 }
 0x488   :  { %v491_v9 = vadd.f32 %v1143_v5, %v490_v8 }
 0x48a   :  { %v492_v10 = vrot.slane %v491_v9, 2 }
 0x48c   :  { %v493_v11 = vadd.f32 %v492_v10, %v491_v9 }
 0x48d   :  { %v1145_v12 = vpop.eup %1144 }
 0x48e   :  { %v496_v13 = vrot.slane %v1145_v12, 4  ;;  %v494_v16 = vrot.slane %v493_v11, 1 }
 0x490   :  { %v497_v17 = vadd.f32 %v1145_v12, %v496_v13  ;;  %v495_v19 = vadd.f32 %v494_v16, %v493_v11 }
 0x492   :  { %v498_v18 = vrot.slane %v497_v17, 2  ;;  %1146 = vrcp.f32 %v495_v19 }
 0x494   :  { %v499_v20 = vadd.f32 %v498_v18, %v497_v17  ;;  %v1114_v18 = vld [vmem:[%s1525_s10 + $0x8] sm:$0xff] }
 0x495   :  { %735 = vmatpush.bf16.msra.mxu0 %v1114_v18  ;;  %v1124_v18 = vld [vmem:[#allocation5 + $0x8] sm:$0xff] }
 0x496   :  { %v500_v21 = vrot.slane %v499_v20, 1  ;;  %915 = vmatpush.bf16.msra.mxu3 %v1124_v18 }
 0x498   :  { %v501_v22 = vadd.f32 %v500_v21, %v499_v20  ;;  %v1147_v23 = vpop.eup %1146  ;;  %v1113_v21 = vld [vmem:[%s1525_s10] sm:$0xff] }
 0x499   :  { %v504_v25 = vmul.f32 %v1147_v23, %v1143_v5  ;;  %736 = vmatpush.bf16.msra.mxu0 %v1113_v21  ;;  %v1122_v23 = vld [vmem:[%s1527_s12 + $0x38] sm:$0xff]  ;;  %v1123_v21 = vld [vmem:[#allocation5] sm:$0xff] }
 0x49a   :  { %1148 = vrcp.f32 %v501_v22  ;;  %809 = vmatpush.bf16.msra.mxu1 %v1122_v23  ;;  %916 = vmatpush.bf16.msra.mxu3 %v1123_v21 }
 0x4a0   :  { %v1149_v24 = vpop.eup %1148 }
 0x4a1   :  { %v505_v26 = vmul.f32 %v1149_v24, %v1145_v12  ;;  %v1121_v24 = vld [vmem:[%s1527_s12 + $0x30] sm:$0xff] }
 0x4a2   :  { %810 = vmatpush.bf16.msra.mxu1 %v1121_v24 }
 0x4a3   :  { %v506_v27 = vpack.c.bf16 %v505_v26, %v504_v25 }
 0x4a5   :  { %579 = vmatmul.bf16.vlgmr.msrb.gmra.mxu2 %v506_v27 }
 0x4a6   :  { %811 = vmatpush.bf16.msra.mxu1 %v1120_v29 }
 0x4aa   :  { %812 = vmatpush.bf16.msra.mxu1 %v1119_v32  ;;  %v874_v32 = vperm.slane %v1349_v7, 7 }
 0x528   :  { %v580_v34 = vpop.f32.mrf.mxu2 }
 0x529   :  { %v585_v35 = vmul.f32 %v580_v34, %v426_v33  ;;  %v691_v34 = vperm.slane %v1349_v7, 4 }
 0x52b   :  { %v587_v36 = vsel %vm90_vm0, %v585_v35, 0.0 }
 0x52c   :  { %v588_v38 = vrot.slane %v587_v36, 4 }
 0x52e   :  { %v589_v39 = vadd.f32 %v588_v38, %v587_v36  ;;  %v1118_v36 = vld [vmem:[%s1527_s12 + $0x18] sm:$0xff] }
 0x52f   :  { %813 = vmatpush.bf16.msra.mxu1 %v1118_v36 }
 0x530   :  { %v590_v41 = vrot.slane %v589_v39, 2  ;;  %v582_v42 = vpop.f32.mrf.mxu2 }
 0x531   :  { %v586_v43 = vmul.f32 %v582_v42, %v428_v40  ;;  %v1117_v42 = vld [vmem:[%s1527_s12 + $0x10] sm:$0xff] }
 0x532   :  { %v591_v44 = vadd.f32 %v590_v41, %v589_v39 }
 0x533   :  { %v594_v45 = vsel %vm90_vm0, %v586_v43, 0.0  ;;  %814 = vmatpush.bf16.msra.mxu1 %v1117_v42 }
 0x534   :  { %v595_v46 = vrot.slane %v594_v45, 4  ;;  %v592_v47 = vrot.slane %v591_v44, 1 }
 0x536   :  { %v596_v48 = vadd.f32 %v595_v46, %v594_v45  ;;  %v593_v51 = vadd.f32 %v592_v47, %v591_v44 }
 0x538   :  { %v597_v49 = vrot.slane %v596_v48, 2  ;;  %v601_v54 = vpack.c.bf16 %v593_v51, %v593_v51 }
 0x53a   :  { %v598_v52 = vadd.f32 %v597_v49, %v596_v48  ;;  %v610_v58 = vunpack.c.l.b16 %v601_v54  ;;  %v1116_v54 = vld [vmem:[%s1527_s12 + $0x8] sm:$0xff] }
 0x53b   :  { %815 = vmatpush.bf16.msra.mxu1 %v1116_v54 }
 0x53c   :  { %v599_v53 = vrot.slane %v598_v52, 1 }
 0x53e   :  { %v600_v55 = vadd.f32 %v599_v53, %v598_v52 }
 0x540   :  { %v602_v56 = vpack.c.bf16 %v600_v55, %v600_v55  ;;  %v1115_v55 = vld [vmem:[%s1527_s12] sm:$0xff] }
 0x541   :  { %816 = vmatpush.bf16.msra.mxu1 %v1115_v55 }
 0x542   :  { %v611_v59 = vunpack.c.l.b16 %v602_v56  ;;  %v1132_v56 = vld [vmem:[%s1526_s11] ss:$0 sm:$0xff] }
 0x544   :  { %v612_v60 = vsel %vm132_vm2, %v611_v59, %v610_v58 }
 0x545   :  { %v613_v57 = vpack.c.b16 %v612_v60, %v612_v60 }
 0x547   :  { %1039 = vmatmul.msk.bf16.vlgmr.msrb.gmra.mxu3 %vm90_vm0, %v613_v57 }
 0x5ca   :  { %v638_v62 = vpop.f32.mrf.mxu3 }
 0x5cb   :  { %v639_v63 = vadd.f32 %v638_v62, %v607_v61  ;;  %v760_v62 = vperm.slane %v1361_v28, 4 }
 0x5cd   :  { %v643_v0 = vrot.slane %v639_v63, 1  ;;  %v646_v2 = vadd.f32 %v639_v63, %v1390_v14 }
 0x5cf   :  { %v647_v1 = vadd.f32 %v643_v0, %v1392_v15 }
 0x5d1   :  { %v650_v3 = vrot.slane %v647_v1, 7 }
 0x5d2   :  { %v640_v4 = vpop.f32.mrf.mxu3 }
 0x5d3   :  { %v651_v5 = vsel %vm132_vm2, %v650_v3, %v646_v2 }
 0x5d4   :  { %v653_v6 = vsel %vm135_vm3, %v651_v5, 0.0 }
 0x5d5   :  { %654 = vadd.xlane.f32.xlu2 %v653_v6 }
 0x648   :  { %v655_v8 = vpop.xlane.xlu2 %654 }
 0x649   :  { %v656_v9 = vmul.f32 %v655_v8, %v1331_v50 }
 0x64b   :  { %v658_v10 = vrot.slane %v656_v9, 1  ;;  %v661_v11 = vsub.f32 %v646_v2, %v656_v9 }
 0x64d   :  { %v662_v12 = vsub.f32 %v647_v1, %v658_v10  ;;  %v663_v16 = vmul.f32 %v661_v11, %v661_v11 }
 0x64f   :  { %v664_v13 = vmul.f32 %v662_v12, %v662_v12 }
 0x651   :  { %v667_v17 = vrot.slane %v664_v13, 7 }
 0x653   :  { %v668_v15 = vsel %vm132_vm2, %v667_v17, %v663_v16 }
 0x654   :  { %v670_v14 = vsel %vm135_vm3, %v668_v15, 0.0 }
 0x655   :  { %671 = vadd.xlane.f32.xlu2 %v670_v14 }
 0x6c8   :  { %v672_v19 = vpop.xlane.xlu2 %671 }
 0x6c9   :  { %v673_v20 = vmul.f32 %v672_v19, %v1331_v50 }
 0x6cb   :  { %v674_v22 = vadd.f32 1e-05, %v673_v20 }
 0x6cd   :  { %1150 = vrsqrt.f32 %v674_v22  ;;  %vm681_vm12 = vweird.f32 %v674_v22 }
 0x6d3   :  { %v1151_v25 = vpop.eup %1150 }
 0x6d4   :  { %v676_v26 = vmul.f32 %v1151_v25, %v674_v22  ;;  %vm682_vm11 = vweird.f32 %v1151_v25 }
 0x6d5   :  { %vm683_vm13 = vmor %vm681_vm12, %vm682_vm11 }
 0x6d6   :  { %v677_v27 = vmul.f32 %v1151_v25, %v676_v26 }
 0x6d8   :  { %v678_v30 = vmul.f32 0.5, %v677_v27 }
 0x6da   :  { %v679_v31 = vsub.f32 1.5, %v678_v30  ;;  %v871_v30 = vperm.slane %v1349_v7, 6  ;;  %v1133_v7 = vld [vmem:[%s1529_s14] ss:$0 sm:$0xff] }
 0x6dc   :  { %v680_v33 = vmul.f32 %v1151_v25, %v679_v31 }
 0x6de   :  { %v684_v35 = vsel %vm683_vm13, %v1151_v25, %v680_v33 }
 0x6df   :  { %v686_v38 = vrot.slane %v684_v35, 1  ;;  %v689_v39 = vmul.f32 %v684_v35, %v661_v11 }
 0x6e1   :  { %v690_v40 = vmul.f32 %v686_v38, %v662_v12  ;;  %v692_v41 = vmul.f32 %v691_v34, %v689_v39 }
 0x6e3   :  { %v693_v43 = vmul.f32 %v691_v34, %v690_v40  ;;  %v695_v44 = vadd.f32 %v694_v37, %v692_v41 }
 0x6e5   :  { %v696_v45 = vadd.f32 %v694_v37, %v693_v43  ;;  %v697_v46 = vpack.c.bf16 %v695_v44, %v695_v44 }
 0x6e7   :  { %v698_v47 = vpack.c.bf16 %v696_v45, %v696_v45  ;;  %v709_v49 = vunpack.c.l.b16 %v697_v46 }
 0x6e9   :  { %v710_v48 = vunpack.c.l.b16 %v698_v47 }
 0x6eb   :  { %v711_v51 = vrot.slane %v710_v48, 7 }
 0x6ed   :  { %v712_v52 = vsel %vm132_vm2, %v711_v51, %v709_v49 }
 0x6ee   :  { %v713_v53 = vpack.c.b16 %v712_v52, %v712_v52 }
 0x6f0   :  { %1048 = vmatmul.msk.bf16.vlgmr.msra.gmra.mxu0 %vm90_vm0, %v713_v53 }
 0x76d   :  { %v738_v58 = vpop.f32.mrf.mxu0 }
 0x76e   :  { %v739_v59 = vadd.f32 %v1132_v56, %v738_v58 }
 0x770   :  { %v742_v60 = vmax.f32 %v739_v59, 0.0 }
 0x772   :  { %v743_v57 = vpack.c.bf16 %v742_v60, %v742_v60 }
 0x774   :  { %817 = vmatmul.bf16.vlgmr.msra.gmra.mxu1 %v743_v57 }
 0x775   :  { %v740_v61 = vpop.f32.mrf.mxu0 }
 0x7f1   :  { %v818_v63 = vpop.f32.mrf.mxu1 }
 0x7f2   :  { %v819_v0 = vadd.f32 %v818_v63, %v760_v62 }
 0x7f4   :  { %v823_v1 = vrot.slane %v819_v0, 1  ;;  %v826_v3 = vadd.f32 %v819_v0, %v695_v44 }
 0x7f6   :  { %v827_v2 = vadd.f32 %v823_v1, %v696_v45 }
 0x7f8   :  { %v830_v4 = vrot.slane %v827_v2, 7 }
 0x7f9   :  { %v820_v5 = vpop.f32.mrf.mxu1 }
 0x7fa   :  { %v831_v6 = vsel %vm132_vm2, %v830_v4, %v826_v3 }
 0x7fb   :  { %v833_v8 = vsel %vm135_vm3, %v831_v6, 0.0 }
 0x7fc   :  { %834 = vadd.xlane.f32.xlu0 %v833_v8 }
 0x86f   :  { %v835_v9 = vpop.xlane.xlu0 %834 }
 0x870   :  { %v836_v10 = vmul.f32 %v835_v9, %v1331_v50 }
 0x872   :  { %v838_v11 = vrot.slane %v836_v10, 1  ;;  %v841_v12 = vsub.f32 %v826_v3, %v836_v10 }
 0x874   :  { %v842_v13 = vsub.f32 %v827_v2, %v838_v11  ;;  %v843_v28 = vmul.f32 %v841_v12, %v841_v12 }
 0x876   :  { %v844_v16 = vmul.f32 %v842_v13, %v842_v13 }
 0x878   :  { %v847_v17 = vrot.slane %v844_v16, 7 }
 0x87a   :  { %v848_v15 = vsel %vm132_vm2, %v847_v17, %v843_v28 }
 0x87b   :  { %v850_v14 = vsel %vm135_vm3, %v848_v15, 0.0 }
 0x87c   :  { %851 = vadd.xlane.f32.xlu1 %v850_v14 }
 0x8ef   :  { %v852_v19 = vpop.xlane.xlu1 %851 }
 0x8f0   :  { %v853_v20 = vmul.f32 %v852_v19, %v1331_v50 }
 0x8f2   :  { %v854_v22 = vadd.f32 1e-05, %v853_v20 }
 0x8f4   :  { %1152 = vrsqrt.f32 %v854_v22  ;;  %vm861_vm15 = vweird.f32 %v854_v22 }
 0x8fa   :  { %v1153_v23 = vpop.eup %1152 }
 0x8fb   :  { %v856_v24 = vmul.f32 %v1153_v23, %v854_v22  ;;  %vm862_vm14 = vweird.f32 %v1153_v23 }
 0x8fc   :  { %vm863_vm1 = vmor %vm861_vm15, %vm862_vm14 }
 0x8fd   :  { %v857_v25 = vmul.f32 %v1153_v23, %v856_v24 }
 0x8ff   :  { %v858_v26 = vmul.f32 0.5, %v857_v25 }
 0x901   :  { %v859_v27 = vsub.f32 1.5, %v858_v26 }
 0x903   :  { %v860_v29 = vmul.f32 %v1153_v23, %v859_v27 }
 0x905   :  { %v864_v31 = vsel %vm863_vm1, %v1153_v23, %v860_v29 }
 0x906   :  { %v866_v50 = vrot.slane %v864_v31, 1  ;;  %v869_v33 = vmul.f32 %v864_v31, %v841_v12 }
 0x908   :  { %v870_v34 = vmul.f32 %v866_v50, %v842_v13  ;;  %v872_v35 = vmul.f32 %v871_v30, %v869_v33 }
 0x90a   :  { %v873_v36 = vmul.f32 %v871_v30, %v870_v34  ;;  %v875_v37 = vadd.f32 %v874_v32, %v872_v35 }
 0x90c   :  { %v876_v38 = vadd.f32 %v874_v32, %v873_v36  ;;  %v877_v39 = vpack.c.bf16 %v875_v37, %v875_v37 }
 0x90e   :  { %v878_v40 = vpack.c.bf16 %v876_v38, %v876_v38  ;;  %v889_v42 = vunpack.c.l.b16 %v877_v39 }
 0x910   :  { %v890_v41 = vunpack.c.l.b16 %v878_v40 }
 0x912   :  { %v891_v43 = vrot.slane %v890_v41, 7 }
 0x914   :  { %v892_v44 = vsel %vm132_vm2, %v891_v43, %v889_v42 }
 0x915   :  { %v893_v45 = vpack.c.b16 %v892_v44, %v892_v44 }
 0x917   :  { %1089 = vmatmul.msk.bf16.vlgmr.msra.gmra.mxu3 %vm90_vm0, %v893_v45 }
 0x99a   :  { %v918_v46 = vpop.f32.mrf.mxu3 }
 0x99b   :  { %v919_v47 = vadd.f32 %v1133_v7, %v918_v46 }
 0x99d   :  { %922 = vst [vmem:[#allocation7] sm:$0x3] %v919_v47 }
 0x99e   :  { %933 = dma.vmem_to_hbm [thread:$0]  %s929_s9, 32, %s931_s0, [#allocation4]  }
 0x9a2   :  { %v920_v48 = vpop.f32.mrf.mxu3 }
 0x9a3   :  { %1230 = dma.done.wait [#allocation4], 32  }
 0x9a4   :  { %1231 = vsyncadd [#allocation4], 4294967264 }
 0x9a5   :  { %938 = vsyncpa [#allocation3], 1 }
 0x9a6   :  { %939 = vsyncpa [#allocation6], 1 }
 0x9a7   :  { %940 = vsyncpa [#allocation4], 1 }

</bundles_post_ra>
